<compile_context>
chip_gen: v6e
topology: v6e:2x2x1
jax: 0.10.0
libtpu: 0.0.40
codegen_flags: <defaults>
</compile_context>

<pallas_src>
import jax
import jax.numpy as jnp
from jax.experimental import pallas as pl
from jax.experimental.pallas import tpu as pltpu

LANE = 128          # TPU lane width (last dim)
BF16_SUBLANE = 16   # bf16 packs 16 rows per sublane group
NEG_SLOPE = 0.01    # F.leaky_relu default negative_slope


def _round_up(n, m):
    return ((n + m - 1) // m) * m


def _cdiv(a, b):
    return (a + b - 1) // b


def _pad2(a, shape):
    pads = tuple((0, t - s) for s, t in zip(a.shape, shape))
    if any(p[1] for p in pads):
        a = jnp.pad(a, pads)
    return a


def _leaky_relu(x):
    # max(x, 0.01*x): one mul + one max on the VPU (cheaper than cmp+select).
    return jnp.maximum(x, NEG_SLOPE * x)


def dqn_kernel(x_ref, w1_ref, b1_ref, w2_ref, b2_ref, w3_ref, b3_ref, o_ref):
    """Fused 3-layer MLP: bf16 MXU matmuls (f32 accumulation), f32 epilogues."""
    cdt = w1_ref.dtype
    x = x_ref[...].astype(cdt)          # in-kernel cast; no wrapper pad/cast pass
    h = jnp.dot(x, w1_ref[...], preferred_element_type=jnp.float32)
    h = _leaky_relu(h + b1_ref[...])
    h = jnp.dot(h.astype(cdt), w2_ref[...], preferred_element_type=jnp.float32)
    h = _leaky_relu(h + b2_ref[...])
    h = jnp.dot(h.astype(cdt), w3_ref[...], preferred_element_type=jnp.float32)
    h = _leaky_relu(h + b3_ref[...])
    o_ref[...] = h.astype(o_ref.dtype)


def init_dqn_params(key, input_size, hidden_size, output_size, dtype=jnp.float32):
    """nn.Linear-style init: uniform(-1/sqrt(fan_in), 1/sqrt(fan_in)).
    Weights stored transposed as (in_features, out_features)."""
    def linear(k, fan_in, fan_out):
        kw, kb = jax.random.split(k)
        bound = 1.0 / jnp.sqrt(jnp.asarray(fan_in, dtype))
        w = jax.random.uniform(kw, (fan_in, fan_out), dtype, -bound, bound)
        b = jax.random.uniform(kb, (fan_out,), dtype, -bound, bound)
        return w, b

    k1, k2, k3 = jax.random.split(key, 3)
    w1, b1 = linear(k1, input_size, hidden_size)
    w2, b2 = linear(k2, hidden_size, hidden_size)
    w3, b3 = linear(k3, hidden_size, output_size)
    return {"w1": w1, "b1": b1, "w2": w2, "b2": b2, "w3": w3, "b3": b3}


def pack_dqn_params(params, compute_dtype=jnp.bfloat16):
    """One-time pack: bf16 weights, f32 biases.  Only the *hidden* dim is
    lane-padded to 128 (zero rows/cols are mathematically inert); input and
    output feature dims stay at their natural sizes so the per-tile HBM
    streams carry no padding."""
    w1, w2, w3 = params["w1"], params["w2"], params["w3"]
    b1, b2, b3 = params["b1"], params["b2"], params["b3"]
    in_sz, hid_sz = w1.shape
    out_sz = w3.shape[1]
    hid_p = _round_up(hid_sz, LANE)
    packed = {
        "w1": _pad2(w1.astype(compute_dtype), (in_sz, hid_p)),
        "b1": _pad2(b1.astype(jnp.float32).reshape(1, -1), (1, hid_p)),
        "w2": _pad2(w2.astype(compute_dtype), (hid_p, hid_p)),
        "b2": _pad2(b2.astype(jnp.float32).reshape(1, -1), (1, hid_p)),
        "w3": _pad2(w3.astype(compute_dtype), (hid_p, out_sz)),
        "b3": b3.astype(jnp.float32).reshape(1, -1),
    }
    meta = dict(in_size=in_sz, hidden_size=hid_sz, out_size=out_sz,
                hid_p=hid_p, compute_dtype=compute_dtype)
    return packed, meta


def _dqn_jnp(x, packed, meta):
    """Small-batch fast path / reference: same bf16-matmul + f32-epilogue math."""
    cdt = meta["compute_dtype"]

    def layer(h, w, b):
        y = jnp.dot(h.astype(cdt), w, preferred_element_type=jnp.float32) + b
        return _leaky_relu(y)

    h = layer(x, packed["w1"], packed["b1"])
    h = layer(h, packed["w2"], packed["b2"])
    h = layer(h, packed["w3"], packed["b3"])
    return h


def dqn_forward(x, packed, meta, *, tile_b_max=512, force_pallas=False,
                jnp_fastpath_max_batch=256):
    """x: (B, inputSize) f32/bf16.  Returns (B, outputSize) f32 Q-values."""
    B, feat = x.shape
    assert feat == meta["in_size"], (feat, meta["in_size"])

    # Small-batch fast path: a per-call Pallas kernel is pure launch/DMA
    # overhead for tiny batches (single-env DQN inference) — fused jnp wins.
    if (not force_pallas) and B <= jnp_fastpath_max_batch:
        return _dqn_jnp(x, packed, meta)

    in_sz, out_sz, hid_p = meta["in_size"], meta["out_size"], meta["hid_p"]
    cdt = meta["compute_dtype"]

    # Batch tiling: multiple of 16 rows (bf16 sublane packing).  If the whole
    # batch fits in one tile but is big enough to split, force >=2 grid steps
    # so the "parallel" axis can shard across both v7x TensorCores.
    tile_b = min(tile_b_max, _round_up(B, BF16_SUBLANE))
    if _cdiv(B, tile_b) == 1 and B > 2 * BF16_SUBLANE:
        tile_b = _round_up(_cdiv(B, 2), BF16_SUBLANE)
    grid = (_cdiv(B, tile_b),)

    w1, b1 = packed["w1"], packed["b1"]
    w2, b2 = packed["w2"], packed["b2"]
    w3, b3 = packed["w3"], packed["b3"]

    # Weights/biases: constant index_map -> VMEM-resident across batch tiles.
    # x / out tiles are the only per-step DMA streams; their last dims equal
    # the full array dims (satisfies the (8,128) rule with no lane padding).
    # The ragged last batch tile is handled by Pallas partial-block masking.
    resident = lambda a: pl.BlockSpec(a.shape, lambda i: (0, 0))
    in_specs = [
        pl.BlockSpec((tile_b, in_sz), lambda i: (i, 0)),
        resident(w1), resident(b1),
        resident(w2), resident(b2),
        resident(w3), resident(b3),
    ]
    out_spec = pl.BlockSpec((tile_b, out_sz), lambda i: (i, 0))

    # Honest VMEM budget: resident weights/biases + double-buffered x/out
    # tiles + compiler-managed f32 intermediates, 2x headroom, clamped well
    # under every generation's scoped/physical VMEM.
    cdt_b = jnp.dtype(cdt).itemsize
    x_b = jnp.dtype(x.dtype).itemsize
    w_bytes = (w1.size + w2.size + w3.size) * cdt_b \
        + (b1.size + b2.size + b3.size) * 4
    io_bytes = 2 * tile_b * (in_sz * x_b + out_sz * 4)
    interm_bytes = 2 * tile_b * hid_p * 4
    vmem_budget = int(min(32 << 20,
                          max(4 << 20, 2 * (w_bytes + io_bytes + interm_bytes))))

    flops = 2 * B * (in_sz * hid_p + hid_p * hid_p + hid_p * out_sz)
    bytes_accessed = B * (in_sz * x_b + out_sz * 4) + w_bytes
    cost = pl.CostEstimate(flops=flops, transcendentals=0,
                           bytes_accessed=bytes_accessed)

    return pl.pallas_call(
        dqn_kernel,
        out_shape=jax.ShapeDtypeStruct((B, out_sz), jnp.float32),
        grid_spec=pltpu.PrefetchScalarGridSpec(
            num_scalar_prefetch=0,
            grid=grid,
            in_specs=in_specs,
            out_specs=out_spec,
        ),
        compiler_params=pltpu.CompilerParams(
            dimension_semantics=("parallel",),
            vmem_limit_bytes=vmem_budget,
        ),
        cost_estimate=cost,
    )(x, w1, b1, w2, b2, w3, b3)


if __name__ == "__main__":
    key = jax.random.PRNGKey(0)
    k_params, k_x1, k_x2 = jax.random.split(key, 3)

    input_size, hidden_size, output_size = 16, 32, 8

    params = init_dqn_params(k_params, input_size, hidden_size, output_size)
    packed, meta = pack_dqn_params(params)

    # Pure-f32 reference matching the PyTorch module's math exactly.
    def ref_f32(x, p):
        def layer(h, w, b):
            y = jnp.dot(h, w, preferred_element_type=jnp.float32) + b
            return jnp.maximum(y, NEG_SLOPE * y)
        h = layer(x, p["w1"], p["b1"])
        h = layer(h, p["w2"], p["b2"])
        h = layer(h, p["w3"], p["b3"])
        return h

    # Case 1: tiny batch at the module's spec shapes, forced through Pallas.
    x_small = jax.random.normal(k_x1, (2, input_size), dtype=jnp.float32)
    out_small = dqn_forward(x_small, packed, meta, force_pallas=True)
    jax.block_until_ready(out_small)
    assert out_small.shape == (2, output_size)
    assert jnp.allclose(out_small, _dqn_jnp(x_small, packed, meta),
                        atol=1e-3, rtol=1e-3)
    # bf16 compute vs pure-f32 reference: loose tolerance (documented above).
    assert jnp.allclose(out_small, ref_f32(x_small, params), atol=1e-1, rtol=1e-1)

    # Case 2: larger batch exercising multi-tile grid + ragged last tile.
    x_big = jax.random.normal(k_x2, (300, input_size), dtype=jnp.float32)
    out_big = dqn_forward(x_big, packed, meta, force_pallas=True)
    jax.block_until_ready(out_big)
    assert out_big.shape == (300, output_size)
    assert jnp.allclose(out_big, _dqn_jnp(x_big, packed, meta),
                        atol=1e-3, rtol=1e-3)
    assert jnp.allclose(out_big, ref_f32(x_big, params), atol=1e-1, rtol=1e-1)

    print("KERNEL_OK")
</pallas_src>

<mosaic_0001>
module attributes {stable_mosaic.version = 11 : i64} {
  func.func @dqn_kernel(%arg0: i32, %arg1: memref<16x16xf32, #tpu.memory_space<vmem>>, %arg2: memref<16x128xbf16, #tpu.memory_space<vmem>>, %arg3: memref<1x128xf32, #tpu.memory_space<vmem>>, %arg4: memref<128x128xbf16, #tpu.memory_space<vmem>>, %arg5: memref<1x128xf32, #tpu.memory_space<vmem>>, %arg6: memref<128x8xbf16, #tpu.memory_space<vmem>>, %arg7: memref<1x8xf32, #tpu.memory_space<vmem>>, %arg8: memref<16x8xf32, #tpu.memory_space<vmem>>) attributes {dimension_semantics = [#tpu.dimension_semantics<parallel>], iteration_bounds = array<i64: 1>, scalar_prefetch = 0 : i64, scratch_operands = 0 : i64, tpu.core_type = #tpu.core_type<tc>, window_params = [{transform_indices = @transform_0, window_bounds = array<i64: 16, 16>}, {pipeline_mode = #tpu.pipeline_mode<synchronous>, transform_indices = @transform_1, window_bounds = array<i64: 16, 128>}, {pipeline_mode = #tpu.pipeline_mode<synchronous>, transform_indices = @transform_2, window_bounds = array<i64: 1, 128>}, {pipeline_mode = #tpu.pipeline_mode<synchronous>, transform_indices = @transform_3, window_bounds = array<i64: 128, 128>}, {pipeline_mode = #tpu.pipeline_mode<synchronous>, transform_indices = @transform_4, window_bounds = array<i64: 1, 128>}, {pipeline_mode = #tpu.pipeline_mode<synchronous>, transform_indices = @transform_5, window_bounds = array<i64: 128, 8>}, {pipeline_mode = #tpu.pipeline_mode<synchronous>, transform_indices = @transform_6, window_bounds = array<i64: 1, 8>}, {transform_indices = @transform_7, window_bounds = array<i64: 16, 8>}]} {
    %c0 = arith.constant 0 : index
    %c0_0 = arith.constant 0 : index
    %0 = vector.load %arg1[%c0, %c0_0] : memref<16x16xf32, #tpu.memory_space<vmem>>, vector<16x16xf32>
    %1 = arith.truncf %0 : vector<16x16xf32> to vector<16x16xbf16>
    %c0_1 = arith.constant 0 : index
    %c0_2 = arith.constant 0 : index
    %2 = vector.load %arg2[%c0_1, %c0_2] : memref<16x128xbf16, #tpu.memory_space<vmem>>, vector<16x128xbf16>
    %cst = arith.constant dense<0.000000e+00> : vector<16x128xf32>
    %3 = tpu.matmul %1, %2, %cst {dimension_numbers = #tpu.dot_dimension_numbers<[1], [0], [0], [1], [0, 0, 1, 1], [], []>} : vector<16x16xbf16>, vector<16x128xbf16>, vector<16x128xf32> -> vector<16x128xf32>
    %c0_3 = arith.constant 0 : index
    %c0_4 = arith.constant 0 : index
    %4 = vector.load %arg3[%c0_3, %c0_4] : memref<1x128xf32, #tpu.memory_space<vmem>>, vector<1x128xf32>
    %5 = vector.broadcast %4 : vector<1x128xf32> to vector<16x128xf32>
    %6 = arith.addf %3, %5 : vector<16x128xf32>
    %cst_5 = arith.constant 0.00999999977 : f32
    %7 = vector.broadcast %cst_5 : f32 to vector<16x128xf32>
    %8 = arith.mulf %7, %6 : vector<16x128xf32>
    %9 = arith.maximumf %6, %8 : vector<16x128xf32>
    %10 = arith.truncf %9 : vector<16x128xf32> to vector<16x128xbf16>
    %c0_6 = arith.constant 0 : index
    %c0_7 = arith.constant 0 : index
    %11 = vector.load %arg4[%c0_6, %c0_7] : memref<128x128xbf16, #tpu.memory_space<vmem>>, vector<128x128xbf16>
    %cst_8 = arith.constant dense<0.000000e+00> : vector<16x128xf32>
    %12 = tpu.matmul %10, %11, %cst_8 {dimension_numbers = #tpu.dot_dimension_numbers<[1], [0], [0], [1], [0, 0, 1, 1], [], []>} : vector<16x128xbf16>, vector<128x128xbf16>, vector<16x128xf32> -> vector<16x128xf32>
    %c0_9 = arith.constant 0 : index
    %c0_10 = arith.constant 0 : index
    %13 = vector.load %arg5[%c0_9, %c0_10] : memref<1x128xf32, #tpu.memory_space<vmem>>, vector<1x128xf32>
    %14 = vector.broadcast %13 : vector<1x128xf32> to vector<16x128xf32>
    %15 = arith.addf %12, %14 : vector<16x128xf32>
    %cst_11 = arith.constant 0.00999999977 : f32
    %16 = vector.broadcast %cst_11 : f32 to vector<16x128xf32>
    %17 = arith.mulf %16, %15 : vector<16x128xf32>
    %18 = arith.maximumf %15, %17 : vector<16x128xf32>
    %19 = arith.truncf %18 : vector<16x128xf32> to vector<16x128xbf16>
    %c0_12 = arith.constant 0 : index
    %c0_13 = arith.constant 0 : index
    %20 = vector.load %arg6[%c0_12, %c0_13] : memref<128x8xbf16, #tpu.memory_space<vmem>>, vector<128x8xbf16>
    %cst_14 = arith.constant dense<0.000000e+00> : vector<16x8xf32>
    %21 = tpu.matmul %19, %20, %cst_14 {dimension_numbers = #tpu.dot_dimension_numbers<[1], [0], [0], [1], [0, 0, 1, 1], [], []>} : vector<16x128xbf16>, vector<128x8xbf16>, vector<16x8xf32> -> vector<16x8xf32>
    %c0_15 = arith.constant 0 : index
    %c0_16 = arith.constant 0 : index
    %22 = vector.load %arg7[%c0_15, %c0_16] : memref<1x8xf32, #tpu.memory_space<vmem>>, vector<1x8xf32>
    %23 = vector.broadcast %22 : vector<1x8xf32> to vector<16x8xf32>
    %24 = arith.addf %21, %23 : vector<16x8xf32>
    %cst_17 = arith.constant 0.00999999977 : f32
    %25 = vector.broadcast %cst_17 : f32 to vector<16x8xf32>
    %26 = arith.mulf %25, %24 : vector<16x8xf32>
    %27 = arith.maximumf %24, %26 : vector<16x8xf32>
    %c0_18 = arith.constant 0 : index
    %c0_19 = arith.constant 0 : index
    %28 = vector.load %arg8[%c0_18, %c0_19] : memref<16x8xf32, #tpu.memory_space<vmem>>, vector<16x8xf32>
    tpu.vector_store %arg8[%c0_18, %c0_19], %27 {strides = array<i32>} : memref<16x8xf32, #tpu.memory_space<vmem>>, vector<16x8xf32>,
    return
  }
  func.func @transform_0(%arg0: i32) -> (i32, i32) {
    %c0_i32 = arith.constant 0 : i32
    %c0_i32_0 = arith.constant 0 : i32
    return %arg0, %c0_i32 : i32, i32
  }
  func.func @transform_1(%arg0: i32) -> (i32, i32) {
    %c0_i32 = arith.constant 0 : i32
    %c0_i32_0 = arith.constant 0 : i32
    %c0_i32_1 = arith.constant 0 : i32
    return %c0_i32, %c0_i32_0 : i32, i32
  }
  func.func @transform_2(%arg0: i32) -> (i32, i32) {
    %c0_i32 = arith.constant 0 : i32
    %c0_i32_0 = arith.constant 0 : i32
    %c0_i32_1 = arith.constant 0 : i32
    return %c0_i32, %c0_i32_0 : i32, i32
  }
  func.func @transform_3(%arg0: i32) -> (i32, i32) {
    %c0_i32 = arith.constant 0 : i32
    %c0_i32_0 = arith.constant 0 : i32
    %c0_i32_1 = arith.constant 0 : i32
    return %c0_i32, %c0_i32_0 : i32, i32
  }
  func.func @transform_4(%arg0: i32) -> (i32, i32) {
    %c0_i32 = arith.constant 0 : i32
    %c0_i32_0 = arith.constant 0 : i32
    %c0_i32_1 = arith.constant 0 : i32
    return %c0_i32, %c0_i32_0 : i32, i32
  }
  func.func @transform_5(%arg0: i32) -> (i32, i32) {
    %c0_i32 = arith.constant 0 : i32
    %c0_i32_0 = arith.constant 0 : i32
    %c0_i32_1 = arith.constant 0 : i32
    return %c0_i32, %c0_i32_0 : i32, i32
  }
  func.func @transform_6(%arg0: i32) -> (i32, i32) {
    %c0_i32 = arith.constant 0 : i32
    %c0_i32_0 = arith.constant 0 : i32
    %c0_i32_1 = arith.constant 0 : i32
    return %c0_i32, %c0_i32_0 : i32, i32
  }
  func.func @transform_7(%arg0: i32) -> (i32, i32) {
    %c0_i32 = arith.constant 0 : i32
    %c0_i32_0 = arith.constant 0 : i32
    return %arg0, %c0_i32 : i32, i32
  }
}

</mosaic_0001>

<bundles_post_ra>
// kernel: tpu_custom_call.1
= control target key start
LH: loop header
LB: loop body
LE: loop exit
PB: predicated region body
PF: predicated region fallthrough
CT: control target
= control target key end

     0   :  { %12 = vsyncpa [#allocation3], 0  ;;  %s695_s0 = inlined_call_operand.hbm [shape: f32[2,16], index: 0, kind: input, shape index: {}]   ;;  %s696_s1 = inlined_call_operand.vmem [shape: bf16[16,128], index: 1, kind: input, shape index: {}]   ;;  %s697_s2 = inlined_call_operand.vmem [shape: f32[1,128], index: 2, kind: input, shape index: {}]   ;;  %s698_s3 = inlined_call_operand.vmem [shape: bf16[128,128], index: 3, kind: input, shape index: {}]   ;;  %s699_s4 = inlined_call_operand.hbm [shape: f32[1,128], index: 4, kind: input, shape index: {}]   ;;  %s700_s5 = inlined_call_operand.vmem [shape: bf16[128,8], index: 5, kind: input, shape index: {}]   ;;  %s701_s6 = inlined_call_operand.vmem [shape: f32[1,8], index: 6, kind: input, shape index: {}]   ;;  %s702_s7 = inlined_call_operand.hbm [shape: f32[2,8], index: 7, kind: output, shape index: {}]  }
   0x1   :  { %13 = vsyncpa [#allocation6], 0 }
   0x2   :  { %14 = vsyncpa [#allocation4], 0 }
   0x3   :  { %19 = vsyncadd [#allocation3], 224  ;;  %s553_s24 = smov [#allocation2]  }
   0x4   :  { %s20_s25 = sshll.u32 %s553_s24, 4  ;;  %s21_s25 = int_to_ptr.vmem [resolvable:$true] %s20_s25 }
   0x5   :  { %s495_s26 = scalar_lea.vmem %s21_s25, 32  ;;  %s499_s27 = scalar_lea.vmem %s21_s25, 256 }
   0x6   :  { %p496_p0 = scmp.ne.s32.totalorder %s21_s25, %s495_s26  ;;  %p500_p1 = scmp.lt.s32.totalorder %s21_s25, %s21_s25 }
   0x7   :  { %p501_p2 = scmp.lt.s32.totalorder %s499_s27, %s495_s26 }
   0x9   :  { %p502_p3 = por %p501_p2, %p500_p1 }
   0xb   :  { %p503_p4 = pnand %p502_p3, %p496_p0 }
   0xd   :  { %506 = shalt.err (!%p503_p4)
}
   0xe   :  { %s554_s28 = smov 32   ;;  %s555_s29 = smov 2  }
   0xf   :  { %26 = dma.hbm_to_vmem [thread:$0]  %s695_s0, 32, %s21_s25, [#allocation3], %s554_s28, %s554_s28, %s555_s29  }
  0x10   :  { %s556_s9 = smov [#allocation5]  }
  0x11   :  { %s39_s10 = sshll.u32 %s556_s9, 4  ;;  %s40_s10 = int_to_ptr.vmem [resolvable:$true] %s39_s10 }
  0x12   :  { %s515_s11 = scalar_lea.vmem %s40_s10, 16  ;;  %s519_s12 = scalar_lea.vmem %s40_s10, 32 }
  0x13   :  { %p516_p5 = scmp.ne.s32.totalorder %s40_s10, %s515_s11  ;;  %p520_p6 = scmp.lt.s32.totalorder %s40_s10, %s40_s10 }
  0x14   :  { %p521_p7 = scmp.lt.s32.totalorder %s519_s12, %s515_s11 }
  0x16   :  { %p522_p8 = por %p521_p7, %p520_p6 }
  0x18   :  { %p523_p9 = pnand %p522_p8, %p516_p5 }
  0x1a   :  { %526 = shalt.err (!%p523_p9)
}
  0x1b   :  { %42 = dma.hbm_to_vmem [thread:$0]  %s699_s4, 16, %s40_s10, [#allocation6]  }
  0x1c   :  { %547 = dma.done.wait [#allocation3], 256  }
  0x1d   :  { %548 = vsyncadd [#allocation3], 4294967040 }
  0x1e   :  { %549 = dma.done.wait [#allocation6], 16  }
  0x1f   :  { %550 = vsyncadd [#allocation6], 4294967280  ;;  %v557_v0 = vmov 0.0   ;;  %vm558_vm0 = vmmov 0   ;;  %v470_v1 = vld [vmem:[%s696_s1] sm:$0xff]   ;;  %v55_v3 = vld [vmem:[#allocation2 + $0x8] sm:$0xff] }
  0x20   :  { %417 = vmatprep.subr.bf16.mxu0 %v557_v0  ;;  %419 = vmatprep.mubr.msk.bf16.mxu0 %vm558_vm0, %v557_v0  ;;  %v54_v2 = vld [vmem:[#allocation2] sm:$0xff]  ;;  %vm72_vm1 = vcmask 130048   ;;  %v471_v5 = vld [vmem:[%s698_s3 + $0x38] sm:$0xff]   ;;  %v472_v6 = vld [vmem:[%s698_s3 + $0x30] sm:$0xff]   ;;  %vm355_vm2 = vcmask 64512  }
  0x21   :  { %423 = vmatprep.subr.bf16.mxu1 %v557_v0  ;;  %439 = vmatprep.mubr.msk.bf16.mxu1 %vm558_vm0, %v557_v0  ;;  %v56_v4 = vpack.c.bf16 %v55_v3, %v54_v2  ;;  %v473_v7 = vld [vmem:[%s698_s3 + $0x28] sm:$0xff]   ;;  %v474_v8 = vld [vmem:[%s698_s3 + $0x20] sm:$0xff]   ;;  %v475_v9 = vld [vmem:[%s698_s3 + $0x18] sm:$0xff]  }
  0x22   :  { %418 = vmatpush3.bf16.msra.mxu0 %v470_v1  ;;  %424 = vmatpush3.bf16.msra.mxu1 %v471_v5  ;;  %v476_v10 = vld [vmem:[%s698_s3 + $0x10] sm:$0xff]   ;;  %v477_v11 = vld [vmem:[%s698_s3 + $0x8] sm:$0xff]   ;;  %v478_v12 = vld [vmem:[%s698_s3] sm:$0xff]  }
  0x23   :  { %443 = vmatprep.subr.bf16.mxu0 %v557_v0  ;;  %425 = vmatprep.subr.bf16.mxu1 %v557_v0  ;;  %v479_v13 = vld [vmem:[%s700_s5 + $0x38] sm:$0xff]   ;;  %v480_v14 = vld [vmem:[%s700_s5 + $0x30] sm:$0xff]   ;;  %v481_v15 = vld [vmem:[%s700_s5 + $0x28] sm:$0xff]  }
  0x24   :  { %v482_v16 = vld [vmem:[%s700_s5 + $0x20] sm:$0xff]   ;;  %v483_v17 = vld [vmem:[%s700_s5 + $0x18] sm:$0xff]   ;;  %v484_v30 = vld [vmem:[%s700_s5 + $0x10] sm:$0xff]  }
  0x25   :  { %420 = vmatmul.mubr.msk.bf16.vlgmr.msra.gmra.mxu0 %vm72_vm1, %v56_v4  ;;  %v376_v18 = vld [vmem:[%s697_s2] ss:$0 sm:$0xff]  ;;  %v485_v31 = vld [vmem:[%s700_s5 + $0x8] sm:$0xff]   ;;  %v379_v33 = vld [vmem:[#allocation5] ss:$0 sm:$0xff] }
  0x26   :  { %459 = vmatprep.mubr.msk.bf16.mxu0 %vm558_vm0, %v557_v0  ;;  %426 = vmatpush3.bf16.msra.mxu1 %v472_v6  ;;  %v486_v32 = vld [vmem:[%s700_s5] sm:$0xff]  }
  0x27   :  { %427 = vmatprep.subr.bf16.mxu1 %v557_v0  ;;  %444 = vmatpush3.bf16.msra.mxu0 %v479_v13  ;;  %v388_v45 = vld [vmem:[%s701_s6] ss:$0 sm:$0xff] }
  0x28   :  { %445 = vmatprep.subr.bf16.mxu0 %v557_v0 }
  0x2a   :  { %428 = vmatpush3.bf16.msra.mxu1 %v473_v7 }
  0x2b   :  { %429 = vmatprep.subr.bf16.mxu1 %v557_v0  ;;  %446 = vmatpush3.bf16.msra.mxu0 %v480_v14 }
  0x2c   :  { %447 = vmatprep.subr.bf16.mxu0 %v557_v0 }
  0x2e   :  { %430 = vmatpush3.bf16.msra.mxu1 %v474_v8 }
  0x2f   :  { %431 = vmatprep.subr.bf16.mxu1 %v557_v0  ;;  %448 = vmatpush3.bf16.msra.mxu0 %v481_v15 }
  0x30   :  { %449 = vmatprep.subr.bf16.mxu0 %v557_v0 }
  0x32   :  { %432 = vmatpush3.bf16.msra.mxu1 %v475_v9 }
  0x33   :  { %433 = vmatprep.subr.bf16.mxu1 %v557_v0  ;;  %450 = vmatpush3.bf16.msra.mxu0 %v482_v16 }
  0x34   :  { %451 = vmatprep.subr.bf16.mxu0 %v557_v0 }
  0x36   :  { %434 = vmatpush3.bf16.msra.mxu1 %v476_v10 }
  0x37   :  { %435 = vmatprep.subr.bf16.mxu1 %v557_v0  ;;  %452 = vmatpush3.bf16.msra.mxu0 %v483_v17 }
  0x38   :  { %453 = vmatprep.subr.bf16.mxu0 %v557_v0 }
  0x3a   :  { %436 = vmatpush3.bf16.msra.mxu1 %v477_v11 }
  0x3b   :  { %437 = vmatprep.subr.bf16.mxu1 %v557_v0  ;;  %454 = vmatpush3.bf16.msra.mxu0 %v484_v30 }
  0x3c   :  { %455 = vmatprep.subr.bf16.mxu0 %v557_v0 }
  0x3e   :  { %438 = vmatpush3.bf16.msra.mxu1 %v478_v12 }
  0x3f   :  { %456 = vmatpush3.bf16.msra.mxu0 %v485_v31 }
  0x40   :  { %457 = vmatprep.subr.bf16.mxu0 %v557_v0 }
  0x43   :  { %458 = vmatpush3.bf16.msra.mxu0 %v486_v32 }
  0xe5   :  { %v110_v19 = vpop.f32.mrf.mxu0 }
  0xe6   :  { %v111_v20 = vadd.f32 %v376_v18, %v110_v19 }
  0xe7   :  { %v421_v21 = vpop.f32.mrf.mxu0 }
  0xe8   :  { %v117_v23 = vmul.f32 0.01, %v111_v20 }
  0xe9   :  { %v113_v22 = vpop.f32.mrf.mxu0 }
  0xea   :  { %v114_v24 = vadd.f32 %v376_v18, %v113_v22  ;;  %v119_v27 = vmax.f32 %v111_v20, %v117_v23 }
  0xeb   :  { %v422_v25 = vpop.f32.mrf.mxu0 }
  0xec   :  { %v118_v26 = vmul.f32 0.01, %v114_v24 }
  0xee   :  { %v120_v28 = vmax.f32 %v114_v24, %v118_v26 }
  0xf0   :  { %v121_v29 = vpack.c.bf16 %v120_v28, %v119_v27 }
  0xf2   :  { %440 = vmatmul.mubr.bf16.vlgmr.msra.gmra.mxu1 %v121_v29 }
 0x1b2   :  { %v227_v34 = vpop.f32.mrf.mxu1 }
 0x1b3   :  { %v228_v35 = vadd.f32 %v379_v33, %v227_v34 }
 0x1b4   :  { %v441_v36 = vpop.f32.mrf.mxu1 }
 0x1b5   :  { %v234_v38 = vmul.f32 0.01, %v228_v35 }
 0x1b6   :  { %v230_v37 = vpop.f32.mrf.mxu1 }
 0x1b7   :  { %v231_v39 = vadd.f32 %v379_v33, %v230_v37  ;;  %v236_v42 = vmax.f32 %v228_v35, %v234_v38 }
 0x1b8   :  { %v442_v40 = vpop.f32.mrf.mxu1 }
 0x1b9   :  { %v235_v41 = vmul.f32 0.01, %v231_v39 }
 0x1bb   :  { %v237_v43 = vmax.f32 %v231_v39, %v235_v41 }
 0x1bd   :  { %v238_v44 = vpack.c.bf16 %v237_v43, %v236_v42 }
 0x1bf   :  { %460 = vmatmul.mubr.bf16.vlgmr.msra.gmra.mxu0 %v238_v44 }
 0x27f   :  { %v344_v46 = vpop.f32.mrf.mxu0 }
 0x280   :  { %v345_v47 = vadd.f32 %v388_v45, %v344_v46 }
 0x281   :  { %v461_v48 = vpop.f32.mrf.mxu0 }
 0x282   :  { %v351_v49 = vmul.f32 0.01, %v345_v47 }
 0x283   :  { %v347_v50 = vpop.f32.mrf.mxu0 }
 0x284   :  { %v353_v51 = vmax.f32 %v345_v47, %v351_v49  ;;  %v348_v52 = vadd.f32 %v388_v45, %v347_v50 }
 0x285   :  { %v462_v53 = vpop.f32.mrf.mxu0 }
 0x286   :  { %356 = vst.msk [vmem:[#allocation7] sm:$0xff] %vm355_vm2, %v353_v51  ;;  %v352_v54 = vmul.f32 0.01, %v348_v52 }
 0x288   :  { %v354_v55 = vmax.f32 %v348_v52, %v352_v54 }
 0x28a   :  { %357 = vst.msk [vmem:[#allocation7 + $0x8] sm:$0xff] %vm355_vm2, %v354_v55 }
 0x28b   :  { %362 = vsyncadd [#allocation4], 224  ;;  %s559_s5 = smov [#allocation7]  }
 0x28c   :  { %s363_s24 = sshll.u32 %s559_s5, 4  ;;  %s364_s24 = int_to_ptr.vmem [resolvable:$true] %s363_s24 }
 0x28d   :  { %s527_s25 = scalar_lea.vmem %s364_s24, 32  ;;  %s531_s6 = scalar_lea.vmem %s364_s24, 256 }
 0x28e   :  { %p528_p10 = scmp.ne.s32.totalorder %s364_s24, %s527_s25  ;;  %p532_p11 = scmp.lt.s32.totalorder %s364_s24, %s364_s24 }
 0x28f   :  { %p533_p12 = scmp.lt.s32.totalorder %s531_s6, %s527_s25 }
 0x291   :  { %p534_p13 = por %p533_p12, %p532_p11 }
 0x293   :  { %p535_p0 = pnand %p534_p13, %p528_p10 }
 0x295   :  { %538 = shalt.err (!%p535_p0)
}
 0x296   :  { %369 = dma.vmem_to_hbm [thread:$0]  %s364_s24, 32, %s702_s7, [#allocation4], %s554_s28, %s554_s28, %s555_s29  }
 0x297   :  { %551 = dma.done.wait [#allocation4], 256  }
 0x298   :  { %552 = vsyncadd [#allocation4], 4294967040 }
 0x299   :  { %373 = vsyncpa [#allocation3], 1 }
 0x29a   :  { %374 = vsyncpa [#allocation6], 1 }
 0x29b   :  { %375 = vsyncpa [#allocation4], 1 }

</bundles_post_ra>
